<compile_context>
chip_gen: v5e
topology: v5e:2x2
jax: 0.10.0
libtpu: 0.0.40
codegen_flags: <defaults>
</compile_context>

<pallas_src>
import functools

import jax
import jax.numpy as jnp
from jax.experimental import pallas as pl
from jax.experimental.pallas import tpu as pltpu


def _round_up(x, m):
    return ((x + m - 1) // m) * m


def _vmem_capacity_bytes():
    """Physical VMEM bytes for this generation; conservative fallback."""
    try:
        info = pltpu.get_tpu_info()
        cap = getattr(info, "vmem_capacity_bytes", None)
        if cap:
            return int(cap)
    except Exception:
        pass
    return 64 * 1024 * 1024  # v7x per-core VMEM (most restrictive)


def _estimate_step_vmem(th, W, cin, c_hidden):
    """Rough per-grid-step VMEM footprint (bytes) for row tile `th`."""
    wp = W + 4
    l0 = (th + 6) * wp            # flattened input band
    l1 = (th + 3) * wp            # hidden / taps flat length
    l2 = th * wp                  # output flat length
    floats = (2 * cin * l0        # double-buffered input band block
              + 2 * l1            # double-buffered mask block
              + 2 * l2            # double-buffered output block
              + 9 * cin * l1      # im2col taps scratch
              + 2 * c_hidden * l1  # conv1 pre-act + SiLU'd hidden
              + 16 * l1)          # (9 -> padded 16) conv2 shift planes
    return 4 * floats


def _pick_row_tile(H, W, cin, c_hidden, budget_bytes):
    """Largest row tile (<=256, <= H rounded up to 8) fitting the VMEM budget."""
    cap = max(8, min(256, _round_up(H, 8)))
    for th in (256, 128, 64, 32, 16, 8):
        if th <= cap and _estimate_step_vmem(th, W, cin, c_hidden) <= budget_bytes:
            return th
    return 8


def _fused_edge_kernel(x_ref, mask_ref, w1_ref, b1_ref, w2_ref, b2_ref, o_ref,
                       taps_ref, *, cin, W, TH):
    """One (batch, row-tile) step of conv3x3+SiLU -> conv3x3+sigmoid.

    x_ref   : (1, 1, cin, (TH+6)*(W+4))  flattened zero-padded input band
    mask_ref: (1, 1, (TH+3)*(W+4))       hidden-pixel validity mask (0/1)
    w1_ref  : (c_hidden, 9*cin)          conv1 weights, (ky,kx,ci)-minor
    b1_ref  : (c_hidden, 1)              conv1 bias
    w2_ref  : (9, c_hidden)              conv2 weights, one row per (ky,kx)
    b2_ref  : (1,)                       conv2 bias (SMEM scalar)
    o_ref   : (1, 1, 1, TH*(W+4))        flat edge-map tile (lane-dense)
    taps_ref: (9*cin, (TH+3)*(W+4))      im2col scratch (VMEM)
    """
    Wp = W + 4
    L1 = (TH + 3) * Wp
    L2 = TH * Wp

    # im2col: 9 lane-shifted copies of the cin band rows, built once per tile
    # and shared by every hidden channel.
    for ky in range(3):
        for kx in range(3):
            k = ky * 3 + kx
            off = ky * Wp + kx
            taps_ref[k * cin:(k + 1) * cin, :] = x_ref[0, 0, :, off:off + L1]

    # conv1 on the MXU: all hidden channels in one matmul, f32 accumulation.
    a = jnp.dot(w1_ref[...], taps_ref[...], preferred_element_type=jnp.float32)
    a = a + b1_ref[...]
    # SiLU with the cheap one-EUP-op sigmoid; then zero hidden pixels lying
    # outside the HxW image (the zero padding the second conv must see).
    h = a * (0.5 * jnp.tanh(0.5 * a) + 0.5)
    h = h * mask_ref[0]

    # conv2: channel contraction on the MXU -> 9 shift planes ...
    p = jnp.dot(w2_ref[...], h, preferred_element_type=jnp.float32)  # (9, L1)

    # ... and the 3x3 spatial fold as 9 shifted adds on the VPU.
    acc = jnp.full((1, L2), b2_ref[0], jnp.float32)
    for ky in range(3):
        for kx in range(3):
            k = ky * 3 + kx
            off = ky * Wp + kx
            acc = acc + p[k:k + 1, off:off + L2]

    o_ref[0, 0] = (0.5 * jnp.tanh(0.5 * acc) + 0.5).astype(o_ref.dtype)


def diffusion_edge_wrapper_forward(x_nchw, params):
    """Facade forward: NCHW image batch -> NCHW single-channel edge map."""
    B, cin, H, W = x_nchw.shape
    w1, b1, w2, b2 = params['w1'], params['b1'], params['w2'], params['b2']
    c_hidden = w1.shape[0]
    assert w1.shape == (c_hidden, cin, 3, 3)
    assert w2.shape == (1, c_hidden, 3, 3)

    # Generation-aware tiling / VMEM limit.
    phys_vmem = _vmem_capacity_bytes()
    vmem_limit = min(phys_vmem * 3 // 4, 100 * 1024 * 1024)
    TH = _pick_row_tile(H, W, cin, c_hidden, int(vmem_limit * 0.8))

    Wp = W + 4
    nt = -(-H // TH)          # ceil(H / TH); H is padded up to nt*TH
    Hp = nt * TH
    L0 = (TH + 6) * Wp
    L1 = (TH + 3) * Wp
    L2 = TH * Wp

    xf = x_nchw.astype(jnp.float32)
    # Zero halo (2 px) + bottom padding up to Hp, + 2 slack rows for the
    # flat-layout tap slices.  Pure layout plumbing, done once in HBM by XLA.
    x_p = jnp.pad(xf, ((0, 0), (0, 0), (2, Hp - H + 4), (2, 2)))
    x_bands = jnp.stack(
        [x_p[:, :, t * TH: t * TH + TH + 6, :] for t in range(nt)], axis=1)
    x_bands = x_bands.reshape(B, nt, cin, L0)

    # Hidden-pixel validity mask, one flat row per tile.
    j_idx = jnp.arange(TH + 3)
    i_idx = jnp.arange(Wp)
    col_ok = (i_idx >= 1) & (i_idx <= W)
    row_img = jnp.arange(nt)[:, None] * TH + j_idx[None, :] - 1
    row_ok = (row_img >= 0) & (row_img < H)
    hmask = (row_ok[:, :, None] & col_ok[None, None, :]).astype(jnp.float32)
    hmask = hmask.reshape(nt, 1, L1)

    # Weights in matmul-friendly layouts (f32, MXU with f32 accumulation).
    w1m = w1.astype(jnp.float32).transpose(0, 2, 3, 1).reshape(c_hidden, 9 * cin)
    b1c = b1.astype(jnp.float32).reshape(c_hidden, 1)
    w2m = w2.astype(jnp.float32)[0].transpose(1, 2, 0).reshape(9, c_hidden)
    b2s = b2.astype(jnp.float32).reshape(1)

    kernel = functools.partial(_fused_edge_kernel, cin=cin, W=W, TH=TH)

    out_flat = pl.pallas_call(
        kernel,
        out_shape=jax.ShapeDtypeStruct((B, nt, 1, L2), jnp.float32),
        grid=(B, nt),
        in_specs=[
            pl.BlockSpec((1, 1, cin, L0), lambda b, t: (b, t, 0, 0)),
            pl.BlockSpec((1, 1, L1), lambda b, t: (t, 0, 0)),
            pl.BlockSpec((c_hidden, 9 * cin), lambda b, t: (0, 0)),
            pl.BlockSpec((c_hidden, 1), lambda b, t: (0, 0)),
            pl.BlockSpec((9, c_hidden), lambda b, t: (0, 0)),
            pl.BlockSpec(memory_space=pltpu.MemorySpace.SMEM),
        ],
        out_specs=pl.BlockSpec((1, 1, 1, L2), lambda b, t: (b, t, 0, 0)),
        scratch_shapes=[pltpu.VMEM((9 * cin, L1), jnp.float32)],
        compiler_params=pltpu.CompilerParams(
            dimension_semantics=("parallel", "parallel"),
            vmem_limit_bytes=int(vmem_limit)),
    )(x_bands, hmask, w1m, b1c, w2m, b2s)

    # Strip junk columns / padded rows (free XLA reshape + slice).
    edge = out_flat.reshape(B, nt * TH, Wp)[:, :H, :W]
    return edge[:, None, :, :].astype(x_nchw.dtype)


def init_detector_params(in_channels=4, hidden=32, seed=0):
    """Deterministic synthetic parameters (PyTorch OIHW layout)."""
    k1, k2, k3, k4 = jax.random.split(jax.random.PRNGKey(seed), 4)
    s1 = 1.0 / (3.0 * (float(in_channels) ** 0.5))
    s2 = 1.0 / (3.0 * (float(hidden) ** 0.5))
    return {
        'w1': jax.random.normal(k1, (hidden, in_channels, 3, 3),
                                jnp.float32) * s1,
        'b1': jax.random.normal(k2, (hidden,), jnp.float32) * 0.1,
        'w2': jax.random.normal(k3, (1, hidden, 3, 3), jnp.float32) * s2,
        'b2': jax.random.normal(k4, (1,), jnp.float32) * 0.1,
    }


def _reference_forward(x, params):
    """Pure-JAX reference (XLA convs, HIGHEST precision)."""
    hi = jax.lax.Precision.HIGHEST
    h = jax.lax.conv_general_dilated(
        x, params['w1'], window_strides=(1, 1), padding=((1, 1), (1, 1)),
        dimension_numbers=('NCHW', 'OIHW', 'NCHW'), precision=hi)
    h = h + params['b1'][None, :, None, None]
    h = h * jax.nn.sigmoid(h)
    e = jax.lax.conv_general_dilated(
        h, params['w2'], window_strides=(1, 1), padding=((1, 1), (1, 1)),
        dimension_numbers=('NCHW', 'OIHW', 'NCHW'), precision=hi)
    e = e + params['b2'][None, :, None, None]
    return jax.nn.sigmoid(e)


if __name__ == "__main__":
    B, C, H, W = 2, 4, 16, 16
    hidden = 32

    x = jax.random.normal(jax.random.PRNGKey(0), (B, C, H, W), jnp.float32)
    params = init_detector_params(in_channels=C, hidden=hidden, seed=0)

    fwd = jax.jit(diffusion_edge_wrapper_forward)
    out = jax.block_until_ready(fwd(x, params))

    assert out.shape == (B, 1, H, W), out.shape
    assert out.dtype == jnp.float32
    assert bool(jnp.all(jnp.isfinite(out)))
    assert bool(jnp.all((out >= 0.0) & (out <= 1.0)))

    ref = _reference_forward(x, params)
    max_err = float(jnp.max(jnp.abs(out - ref)))
    # 1e-3 tolerance covers possible MXU pass-reduction for f32 matmuls; in
    # practice the error is ~1e-6.
    assert bool(jnp.allclose(out, ref, rtol=1e-3, atol=1e-3)), max_err

    print("KERNEL_OK")
</pallas_src>

<mosaic_0001>
module attributes {stable_mosaic.version = 11 : i64} {
  func.func @_fused_edge_kernel(%arg0: i32, %arg1: i32, %arg2: memref<1x1x4x440xf32, #tpu.memory_space<vmem>>, %arg3: memref<1x1x380xf32, #tpu.memory_space<vmem>>, %arg4: memref<32x36xf32, #tpu.memory_space<vmem>>, %arg5: memref<32x1xf32, #tpu.memory_space<vmem>>, %arg6: memref<9x32xf32, #tpu.memory_space<vmem>>, %arg7: memref<1xf32, #tpu.memory_space<smem>>, %arg8: memref<1x1x1x320xf32, #tpu.memory_space<vmem>>, %arg9: memref<36x380xf32, #tpu.memory_space<vmem>>) attributes {dimension_semantics = [#tpu.dimension_semantics<parallel>, #tpu.dimension_semantics<parallel>], iteration_bounds = array<i64: 2, 1>, scalar_prefetch = 0 : i64, scratch_operands = 1 : i64, tpu.core_type = #tpu.core_type<tc>, window_params = [{transform_indices = @transform_0, window_bounds = array<i64: 1, 1, 4, 440>}, {transform_indices = @transform_1, window_bounds = array<i64: 1, 1, 380>}, {pipeline_mode = #tpu.pipeline_mode<synchronous>, transform_indices = @transform_2, window_bounds = array<i64: 32, 36>}, {pipeline_mode = #tpu.pipeline_mode<synchronous>, transform_indices = @transform_3, window_bounds = array<i64: 32, 1>}, {pipeline_mode = #tpu.pipeline_mode<synchronous>, transform_indices = @transform_4, window_bounds = array<i64: 9, 32>}, {transform_indices = @transform_5, window_bounds = array<i64: 1>}, {transform_indices = @transform_6, window_bounds = array<i64: 1, 1, 1, 320>}]} {
    %c0 = arith.constant 0 : index
    %c0_0 = arith.constant 0 : index
    %c0_1 = arith.constant 0 : index
    %c0_2 = arith.constant 0 : index
    %0 = vector.load %arg2[%c0, %c0_0, %c0_1, %c0_2] : memref<1x1x4x440xf32, #tpu.memory_space<vmem>>, vector<1x1x4x380xf32>
    %1 = vector.shape_cast %0 : vector<1x1x4x380xf32> to vector<4x380xf32>
    %c0_3 = arith.constant 0 : index
    %c0_4 = arith.constant 0 : index
    %2 = vector.load %arg9[%c0_3, %c0_4] : memref<36x380xf32, #tpu.memory_space<vmem>>, vector<4x380xf32>
    tpu.vector_store %arg9[%c0_3, %c0_4], %1 {strides = array<i32>} : memref<36x380xf32, #tpu.memory_space<vmem>>, vector<4x380xf32>,
    %c0_5 = arith.constant 0 : index
    %c0_6 = arith.constant 0 : index
    %c0_7 = arith.constant 0 : index
    %c1 = arith.constant 1 : index
    %3 = vector.load %arg2[%c0_5, %c0_6, %c0_7, %c1] : memref<1x1x4x440xf32, #tpu.memory_space<vmem>>, vector<1x1x4x380xf32>
    %4 = vector.shape_cast %3 : vector<1x1x4x380xf32> to vector<4x380xf32>
    %c4 = arith.constant 4 : index
    %c0_8 = arith.constant 0 : index
    %5 = vector.load %arg9[%c4, %c0_8] : memref<36x380xf32, #tpu.memory_space<vmem>>, vector<4x380xf32>
    tpu.vector_store %arg9[%c4, %c0_8], %4 {strides = array<i32>} : memref<36x380xf32, #tpu.memory_space<vmem>>, vector<4x380xf32>,
    %c0_9 = arith.constant 0 : index
    %c0_10 = arith.constant 0 : index
    %c0_11 = arith.constant 0 : index
    %c2 = arith.constant 2 : index
    %6 = vector.load %arg2[%c0_9, %c0_10, %c0_11, %c2] : memref<1x1x4x440xf32, #tpu.memory_space<vmem>>, vector<1x1x4x380xf32>
    %7 = vector.shape_cast %6 : vector<1x1x4x380xf32> to vector<4x380xf32>
    %c8 = arith.constant 8 : index
    %c0_12 = arith.constant 0 : index
    %8 = vector.load %arg9[%c8, %c0_12] : memref<36x380xf32, #tpu.memory_space<vmem>>, vector<4x380xf32>
    tpu.vector_store %arg9[%c8, %c0_12], %7 {strides = array<i32>} : memref<36x380xf32, #tpu.memory_space<vmem>>, vector<4x380xf32>,
    %c0_13 = arith.constant 0 : index
    %c0_14 = arith.constant 0 : index
    %c0_15 = arith.constant 0 : index
    %c20 = arith.constant 20 : index
    %9 = vector.load %arg2[%c0_13, %c0_14, %c0_15, %c20] : memref<1x1x4x440xf32, #tpu.memory_space<vmem>>, vector<1x1x4x380xf32>
    %10 = vector.shape_cast %9 : vector<1x1x4x380xf32> to vector<4x380xf32>
    %c12 = arith.constant 12 : index
    %c0_16 = arith.constant 0 : index
    %11 = vector.load %arg9[%c12, %c0_16] : memref<36x380xf32, #tpu.memory_space<vmem>>, vector<4x380xf32>
    tpu.vector_store %arg9[%c12, %c0_16], %10 {strides = array<i32>} : memref<36x380xf32, #tpu.memory_space<vmem>>, vector<4x380xf32>,
    %c0_17 = arith.constant 0 : index
    %c0_18 = arith.constant 0 : index
    %c0_19 = arith.constant 0 : index
    %c21 = arith.constant 21 : index
    %12 = vector.load %arg2[%c0_17, %c0_18, %c0_19, %c21] : memref<1x1x4x440xf32, #tpu.memory_space<vmem>>, vector<1x1x4x380xf32>
    %13 = vector.shape_cast %12 : vector<1x1x4x380xf32> to vector<4x380xf32>
    %c16 = arith.constant 16 : index
    %c0_20 = arith.constant 0 : index
    %14 = vector.load %arg9[%c16, %c0_20] : memref<36x380xf32, #tpu.memory_space<vmem>>, vector<4x380xf32>
    tpu.vector_store %arg9[%c16, %c0_20], %13 {strides = array<i32>} : memref<36x380xf32, #tpu.memory_space<vmem>>, vector<4x380xf32>,
    %c0_21 = arith.constant 0 : index
    %c0_22 = arith.constant 0 : index
    %c0_23 = arith.constant 0 : index
    %c22 = arith.constant 22 : index
    %15 = vector.load %arg2[%c0_21, %c0_22, %c0_23, %c22] : memref<1x1x4x440xf32, #tpu.memory_space<vmem>>, vector<1x1x4x380xf32>
    %16 = vector.shape_cast %15 : vector<1x1x4x380xf32> to vector<4x380xf32>
    %c20_24 = arith.constant 20 : index
    %c0_25 = arith.constant 0 : index
    %17 = vector.load %arg9[%c20_24, %c0_25] : memref<36x380xf32, #tpu.memory_space<vmem>>, vector<4x380xf32>
    tpu.vector_store %arg9[%c20_24, %c0_25], %16 {strides = array<i32>} : memref<36x380xf32, #tpu.memory_space<vmem>>, vector<4x380xf32>,
    %c0_26 = arith.constant 0 : index
    %c0_27 = arith.constant 0 : index
    %c0_28 = arith.constant 0 : index
    %c40 = arith.constant 40 : index
    %18 = vector.load %arg2[%c0_26, %c0_27, %c0_28, %c40] : memref<1x1x4x440xf32, #tpu.memory_space<vmem>>, vector<1x1x4x380xf32>
    %19 = vector.shape_cast %18 : vector<1x1x4x380xf32> to vector<4x380xf32>
    %c24 = arith.constant 24 : index
    %c0_29 = arith.constant 0 : index
    %20 = vector.load %arg9[%c24, %c0_29] : memref<36x380xf32, #tpu.memory_space<vmem>>, vector<4x380xf32>
    tpu.vector_store %arg9[%c24, %c0_29], %19 {strides = array<i32>} : memref<36x380xf32, #tpu.memory_space<vmem>>, vector<4x380xf32>,
    %c0_30 = arith.constant 0 : index
    %c0_31 = arith.constant 0 : index
    %c0_32 = arith.constant 0 : index
    %c41 = arith.constant 41 : index
    %21 = vector.load %arg2[%c0_30, %c0_31, %c0_32, %c41] : memref<1x1x4x440xf32, #tpu.memory_space<vmem>>, vector<1x1x4x380xf32>
    %22 = vector.shape_cast %21 : vector<1x1x4x380xf32> to vector<4x380xf32>
    %c28 = arith.constant 28 : index
    %c0_33 = arith.constant 0 : index
    %23 = vector.load %arg9[%c28, %c0_33] : memref<36x380xf32, #tpu.memory_space<vmem>>, vector<4x380xf32>
    tpu.vector_store %arg9[%c28, %c0_33], %22 {strides = array<i32>} : memref<36x380xf32, #tpu.memory_space<vmem>>, vector<4x380xf32>,
    %c0_34 = arith.constant 0 : index
    %c0_35 = arith.constant 0 : index
    %c0_36 = arith.constant 0 : index
    %c42 = arith.constant 42 : index
    %24 = vector.load %arg2[%c0_34, %c0_35, %c0_36, %c42] : memref<1x1x4x440xf32, #tpu.memory_space<vmem>>, vector<1x1x4x380xf32>
    %25 = vector.shape_cast %24 : vector<1x1x4x380xf32> to vector<4x380xf32>
    %c32 = arith.constant 32 : index
    %c0_37 = arith.constant 0 : index
    %26 = vector.load %arg9[%c32, %c0_37] : memref<36x380xf32, #tpu.memory_space<vmem>>, vector<4x380xf32>
    tpu.vector_store %arg9[%c32, %c0_37], %25 {strides = array<i32>} : memref<36x380xf32, #tpu.memory_space<vmem>>, vector<4x380xf32>,
    %c0_38 = arith.constant 0 : index
    %c0_39 = arith.constant 0 : index
    %27 = vector.load %arg4[%c0_38, %c0_39] : memref<32x36xf32, #tpu.memory_space<vmem>>, vector<32x36xf32>
    %c0_40 = arith.constant 0 : index
    %c0_41 = arith.constant 0 : index
    %28 = vector.load %arg9[%c0_40, %c0_41] : memref<36x380xf32, #tpu.memory_space<vmem>>, vector<36x380xf32>
    %cst = arith.constant dense<0.000000e+00> : vector<32x380xf32>
    %29 = tpu.matmul %27, %28, %cst {dimension_numbers = #tpu.dot_dimension_numbers<[1], [0], [0], [1], [0, 0, 1, 1], [], []>} : vector<32x36xf32>, vector<36x380xf32>, vector<32x380xf32> -> vector<32x380xf32>
    %c0_42 = arith.constant 0 : index
    %c0_43 = arith.constant 0 : index
    %30 = vector.load %arg5[%c0_42, %c0_43] : memref<32x1xf32, #tpu.memory_space<vmem>>, vector<32x1xf32>
    %31 = vector.broadcast %30 : vector<32x1xf32> to vector<32x380xf32>
    %32 = arith.addf %29, %31 : vector<32x380xf32>
    %cst_44 = arith.constant 5.000000e-01 : f32
    %33 = vector.broadcast %cst_44 : f32 to vector<32x380xf32>
    %34 = arith.mulf %33, %32 : vector<32x380xf32>
    %35 = math.tanh %34 : vector<32x380xf32>
    %cst_45 = arith.constant 5.000000e-01 : f32
    %36 = vector.broadcast %cst_45 : f32 to vector<32x380xf32>
    %37 = arith.mulf %36, %35 : vector<32x380xf32>
    %cst_46 = arith.constant 5.000000e-01 : f32
    %38 = vector.broadcast %cst_46 : f32 to vector<32x380xf32>
    %39 = arith.addf %37, %38 : vector<32x380xf32>
    %40 = arith.mulf %32, %39 : vector<32x380xf32>
    %c0_47 = arith.constant 0 : index
    %c0_48 = arith.constant 0 : index
    %c0_49 = arith.constant 0 : index
    %41 = vector.load %arg3[%c0_47, %c0_48, %c0_49] : memref<1x1x380xf32, #tpu.memory_space<vmem>>, vector<1x1x380xf32>
    %42 = vector.shape_cast %41 : vector<1x1x380xf32> to vector<1x380xf32>
    %43 = vector.broadcast %42 : vector<1x380xf32> to vector<32x380xf32>
    %44 = arith.mulf %40, %43 : vector<32x380xf32>
    %c0_50 = arith.constant 0 : index
    %c0_51 = arith.constant 0 : index
    %45 = vector.load %arg6[%c0_50, %c0_51] : memref<9x32xf32, #tpu.memory_space<vmem>>, vector<9x32xf32>
    %cst_52 = arith.constant dense<0.000000e+00> : vector<9x380xf32>
    %46 = tpu.matmul %45, %44, %cst_52 {dimension_numbers = #tpu.dot_dimension_numbers<[1], [0], [0], [1], [0, 0, 1, 1], [], []>} : vector<9x32xf32>, vector<32x380xf32>, vector<9x380xf32> -> vector<9x380xf32>
    %c0_53 = arith.constant 0 : index
    %47 = memref.load %arg7[%c0_53] : memref<1xf32, #tpu.memory_space<smem>>
    %48 = vector.broadcast %47 : f32 to vector<1x320xf32>
    %49 = vector.extract_strided_slice %46 {offsets = [0, 0], sizes = [1, 320], strides = [1, 1]} : vector<9x380xf32> to vector<1x320xf32>
    %50 = arith.addf %48, %49 : vector<1x320xf32>
    %51 = vector.extract_strided_slice %46 {offsets = [1, 1], sizes = [1, 320], strides = [1, 1]} : vector<9x380xf32> to vector<1x320xf32>
    %52 = arith.addf %50, %51 : vector<1x320xf32>
    %53 = vector.extract_strided_slice %46 {offsets = [2, 2], sizes = [1, 320], strides = [1, 1]} : vector<9x380xf32> to vector<1x320xf32>
    %54 = arith.addf %52, %53 : vector<1x320xf32>
    %55 = vector.extract_strided_slice %46 {offsets = [3, 20], sizes = [1, 320], strides = [1, 1]} : vector<9x380xf32> to vector<1x320xf32>
    %56 = arith.addf %54, %55 : vector<1x320xf32>
    %57 = vector.extract_strided_slice %46 {offsets = [4, 21], sizes = [1, 320], strides = [1, 1]} : vector<9x380xf32> to vector<1x320xf32>
    %58 = arith.addf %56, %57 : vector<1x320xf32>
    %59 = vector.extract_strided_slice %46 {offsets = [5, 22], sizes = [1, 320], strides = [1, 1]} : vector<9x380xf32> to vector<1x320xf32>
    %60 = arith.addf %58, %59 : vector<1x320xf32>
    %61 = vector.extract_strided_slice %46 {offsets = [6, 40], sizes = [1, 320], strides = [1, 1]} : vector<9x380xf32> to vector<1x320xf32>
    %62 = arith.addf %60, %61 : vector<1x320xf32>
    %63 = vector.extract_strided_slice %46 {offsets = [7, 41], sizes = [1, 320], strides = [1, 1]} : vector<9x380xf32> to vector<1x320xf32>
    %64 = arith.addf %62, %63 : vector<1x320xf32>
    %65 = vector.extract_strided_slice %46 {offsets = [8, 42], sizes = [1, 320], strides = [1, 1]} : vector<9x380xf32> to vector<1x320xf32>
    %66 = arith.addf %64, %65 : vector<1x320xf32>
    %cst_54 = arith.constant 5.000000e-01 : f32
    %67 = vector.broadcast %cst_54 : f32 to vector<1x320xf32>
    %68 = arith.mulf %67, %66 : vector<1x320xf32>
    %69 = math.tanh %68 : vector<1x320xf32>
    %cst_55 = arith.constant 5.000000e-01 : f32
    %70 = vector.broadcast %cst_55 : f32 to vector<1x320xf32>
    %71 = arith.mulf %70, %69 : vector<1x320xf32>
    %cst_56 = arith.constant 5.000000e-01 : f32
    %72 = vector.broadcast %cst_56 : f32 to vector<1x320xf32>
    %73 = arith.addf %71, %72 : vector<1x320xf32>
    %c0_57 = arith.constant 0 : index
    %c0_58 = arith.constant 0 : index
    %c0_59 = arith.constant 0 : index
    %c0_60 = arith.constant 0 : index
    %74 = vector.load %arg8[%c0_57, %c0_58, %c0_59, %c0_60] : memref<1x1x1x320xf32, #tpu.memory_space<vmem>>, vector<1x1x1x320xf32>
    %75 = vector.shape_cast %74 : vector<1x1x1x320xf32> to vector<1x320xf32>
    %76 = vector.shape_cast %73 : vector<1x320xf32> to vector<1x1x1x320xf32>
    tpu.vector_store %arg8[%c0_57, %c0_58, %c0_59, %c0_60], %76 {strides = array<i32>} : memref<1x1x1x320xf32, #tpu.memory_space<vmem>>, vector<1x1x1x320xf32>,
    return
  }
  func.func @transform_0(%arg0: i32, %arg1: i32) -> (i32, i32, i32, i32) {
    %c0_i32 = arith.constant 0 : i32
    %c0_i32_0 = arith.constant 0 : i32
    %c0_i32_1 = arith.constant 0 : i32
    return %arg0, %arg1, %c0_i32, %c0_i32_0 : i32, i32, i32, i32
  }
  func.func @transform_1(%arg0: i32, %arg1: i32) -> (i32, i32, i32) {
    %c0_i32 = arith.constant 0 : i32
    %c0_i32_0 = arith.constant 0 : i32
    %c0_i32_1 = arith.constant 0 : i32
    return %arg1, %c0_i32, %c0_i32_0 : i32, i32, i32
  }
  func.func @transform_2(%arg0: i32, %arg1: i32) -> (i32, i32) {
    %c0_i32 = arith.constant 0 : i32
    %c0_i32_0 = arith.constant 0 : i32
    %c0_i32_1 = arith.constant 0 : i32
    return %c0_i32, %c0_i32_0 : i32, i32
  }
  func.func @transform_3(%arg0: i32, %arg1: i32) -> (i32, i32) {
    %c0_i32 = arith.constant 0 : i32
    %c0_i32_0 = arith.constant 0 : i32
    %c0_i32_1 = arith.constant 0 : i32
    return %c0_i32, %c0_i32_0 : i32, i32
  }
  func.func @transform_4(%arg0: i32, %arg1: i32) -> (i32, i32) {
    %c0_i32 = arith.constant 0 : i32
    %c0_i32_0 = arith.constant 0 : i32
    %c0_i32_1 = arith.constant 0 : i32
    return %c0_i32, %c0_i32_0 : i32, i32
  }
  func.func @transform_5(%arg0: i32, %arg1: i32) -> i32 {
    %c0_i32 = arith.constant 0 : i32
    %c0_i32_0 = arith.constant 0 : i32
    return %c0_i32 : i32
  }
  func.func @transform_6(%arg0: i32, %arg1: i32) -> (i32, i32, i32, i32) {
    %c0_i32 = arith.constant 0 : i32
    %c0_i32_0 = arith.constant 0 : i32
    %c0_i32_1 = arith.constant 0 : i32
    return %arg0, %arg1, %c0_i32, %c0_i32_0 : i32, i32, i32, i32
  }
}

</mosaic_0001>

<bundles_post_ra>
// kernel: diffusion_edge_wrapper_forward.1
= control target key start
LH: loop header
LB: loop body
LE: loop exit
PB: predicated region body
PF: predicated region fallthrough
CT: control target
= control target key end

     0   :  { %s1308_s23 = smov 0   ;;  %s1310_s24 = smov 0   ;;  %s1595_s0 = inlined_call_operand.vmem [shape: f32[2,1,4,440], index: 0, kind: input, shape index: {}]   ;;  %s1596_s1 = inlined_call_operand.vmem [shape: f32[1,1,380], index: 1, kind: input, shape index: {}]   ;;  %s1597_s2 = inlined_call_operand.vmem [shape: f32[32,36], index: 2, kind: input, shape index: {}]   ;;  %s1598_s3 = inlined_call_operand.vmem [shape: f32[32,1], index: 3, kind: input, shape index: {}]   ;;  %s1599_s4 = inlined_call_operand.vmem [shape: f32[9,32], index: 4, kind: input, shape index: {}]   ;;  %s1600_s5 = inlined_call_operand.<no memory space> [shape: f32[1], index: 5, kind: input, shape index: {}]   ;;  %s1601_s6 = inlined_call_operand.vmem [shape: f32[2,1,1,320], index: 6, kind: output, shape index: {}]  }
   0x1   :  { %11 = sst [smem:[#allocation3]] %s1600_s5  ;;  %s1312_s25 = smov 0  }
   0x2 LB: > { %s29_s5 = sadd.s32 1, %s1255_s24  ;;  %p1139_p0 = scmp.ge.s32.totalorder %s1259_s25, 1  ;;  %s1259_s25 = sphi %s1312_s25, %s17_s25   ;;  %s1255_s24 = sphi %s1310_s24, %s1603_s24   ;;  %s1251_s23 = sphi %s1308_s23, %s1602_s23  }
   0x3   : > { %p31_p1 = scmp.ge.s32.totalorder %s29_s5, 2  ;;  %p242_p2 = scmp.lt.s32.totalorder %s1259_s25, 3 }
   0x5   : > { %s1605_s5 = smov (%p31_p1, %s29_s5), 0  ;;  %p243_p3 = pnand %p1139_p0, %p242_p2 }
   0x6   : > { %p283_p4 = scmp.lt.s32.totalorder (!%p243_p3), %s1251_s23, 1  ;;  %s1261_s30 = smov (!%p243_p3), 127  }
   0x7   : > { %246 = sbr.rel (%p243_p3) target bundleno = 760 (0x2f8), region = 44  ;;  %s1262_s7 = smov (!%p243_p3), 126  }
   0x8   : > { %s1263_s8 = smov (!%p243_p3), 108   ;;  %s1264_s9 = smov (!%p243_p3), 107  }
   0x9   : > { %s1265_s10 = smov (!%p243_p3), 106   ;;  %s1266_s11 = smov (!%p243_p3), 88  }
   0xa   : > { %s1267_s12 = smov (!%p243_p3), 87   ;;  %s1268_s13 = smov (!%p243_p3), 86  }
   0xc   : > { %s1607_s23 = smov (!%p283_p4, %s1251_s23), 1  ;;  %vm338_vm0 = vcmask 1039360   ;;  %vm364_vm1 = vcmask 1031168   ;;  %vm393_vm2 = vcmask 883712   ;;  %vm422_vm3 = vcmask 875520  }
   0xd   : > { %s1165_s26 = sshll.u32 %s1607_s23, 4  ;;  %vm452_vm4 = vcmask 867328   ;;  %vm319_vm5 = vcmask 1010688   ;;  %vm511_vm6 = vcmask 711680   ;;  %vm481_vm7 = vcmask 719872  }
   0xe   : > { %s291_s29 = scalar_lea.vmem %s1595_s0, %s1165_s26  ;;  %vm346_vm8 = vcmask 1014788   ;;  %vm540_vm9 = vcmask 703488   ;;  %vm606_vm10 = vcmask 1043456   ;;  %vm593_vm11 = vcmask 293888  }
   0xf   : > { %v1332_v0 = vld [vmem:[%s291_s29] sm:$0xff]  ;;  %v305_v1 = vld [vmem:[%s291_s29 + $0x8] sm:$0xf]  ;;  %vm785_vm12 = vcmask 261120   ;;  %vm1022_vm13 = vcmask 1040384   ;;  %vm1024_vm14 = vcmask 1041408  }
  0x10   : > { %308 = vst [vmem:[#allocation1] ss:$2 sm:$0xff] %v1332_v0  ;;  %v322_v2 = vld [vmem:[%s291_s29 + $0x8] sm:$0xf] }
  0x11   : > { %310 = vst [vmem:[#allocation1 + $0x10] ss:$2 sm:$0xff] %v305_v1  ;;  %v349_v8 = vld [vmem:[%s291_s29 + $0x8] sm:$0xf] }
  0x12   : > { %v374_v12 = vld [vmem:[%s291_s29 + $0x8] sm:$0xff] }
  0x17   : > { %v311_v3 = vld.sshfl [vmem:[#allocation1] sm:$0xff pattern:$0x75316420]  ;;  %v312_v4 = vld.sshfl [vmem:[#allocation1 + $0x8] sm:$0xff pattern:$0x75316420] }
  0x18   : > { %326 = vst [vmem:[#allocation1 + $0x1] ss:$2 sm:$0xff] %v1332_v0  ;;  %v1336_v5 = vld.sshfl [vmem:[#allocation1 + $0x10] sm:$0xff pattern:$0x75316420] }
  0x19   : > { %317 = vst [vmem:[#allocation2] sm:$0xf] %v311_v3 }
  0x1a   : > { %318 = vst [vmem:[#allocation2 + $0x8] sm:$0xf] %v312_v4 }
  0x1b   : > { %328 = vst [vmem:[#allocation1 + $0x11] ss:$2 sm:$0xff] %v322_v2 }
  0x1c   : > { %320 = vst.msk [vmem:[#allocation2 + $0x10] sm:$0xf] %vm319_vm5, %v1336_v5 }
  0x1f   : > { %v330_v6 = vld.sshfl [vmem:[#allocation1 + $0x8] sm:$0xff pattern:$0x75316420]  ;;  %v329_v7 = vld.sshfl [vmem:[#allocation1] sm:$0xff pattern:$0x75316420] }
  0x20   : > { %334 = vrot.lane.b32.xlu0 %v330_v6, %s1261_s30  ;;  %352 = vst [vmem:[#allocation1] ss:$2 sm:$0xff] %v1332_v0  ;;  %332 = vrot.lane.b32.xlu2 %v329_v7, %s1261_s30  ;;  %v1269_v6 = vmov 0   ;;  %v571_v7 = vld [vmem:[%s1598_s3 + $0x10] sm:$0xff] }
  0x21   : > { %1205 = vset.pattern.permute.xlu1 %v1269_v6  ;;  %1204 = vset.pattern.permute.xlu0 %v1269_v6 }
  0x22   : > { %v1341_v9 = vld.sshfl [vmem:[#allocation1 + $0x10] sm:$0xff pattern:$0x75316420]  ;;  %1206 = vset.pattern.permute.xlu2 %v1269_v6 }
  0x23   : > { %354 = vst [vmem:[#allocation1 + $0x10] ss:$2 sm:$0xff] %v349_v8 }
  0x27   : > { %v355_v10 = vld.sshfl [vmem:[#allocation1] sm:$0xff pattern:$0x75316420]  ;;  %v356_v11 = vld.sshfl [vmem:[#allocation1 + $0x8] sm:$0xff pattern:$0x75316420] }
  0x28   : > { %358 = vrot.lane.b32.xlu1 %v355_v10, %s1262_s7  ;;  %378 = vst [vmem:[#allocation1 + $0x1] ss:$2 sm:$0xff] %v1332_v0  ;;  %360 = vrot.lane.b32.xlu2 %v356_v11, %s1262_s7 }
  0x2a   : > { %v357_v13 = vld.sshfl [vmem:[#allocation1 + $0x10] sm:$0xff pattern:$0x75316420] }
  0x2b   : > { %380 = vst [vmem:[#allocation1 + $0x11] ss:$2 sm:$0xff] %v374_v12 }
  0x2f   : > { %v382_v14 = vld.sshfl [vmem:[#allocation1 + $0x8] sm:$0xff pattern:$0x75316420]  ;;  %v381_v15 = vld.sshfl [vmem:[#allocation1] sm:$0xff pattern:$0x75316420] }
  0x30   : > { %387 = vrot.lane.b32.xlu1 %v382_v14, %s1263_s8  ;;  %385 = vrot.lane.b32.xlu0 %v381_v15, %s1263_s8  ;;  %407 = vst [vmem:[#allocation1] ss:$2 sm:$0xff] %v1332_v0 }
  0x32   : > { %v383_v16 = vld.sshfl [vmem:[#allocation1 + $0x10] sm:$0xff pattern:$0x75316420]  ;;  %v384_v17 = vld.sshfl [vmem:[#allocation1 + $0x18] sm:$0xff pattern:$0x75316420] }
  0x33   : > { %409 = vst [vmem:[#allocation1 + $0x10] ss:$2 sm:$0xff] %v374_v12 }
  0x37   : > { %v411_v18 = vld.sshfl [vmem:[#allocation1 + $0x8] sm:$0xff pattern:$0x75316420]  ;;  %v410_v19 = vld.sshfl [vmem:[#allocation1] sm:$0xff pattern:$0x75316420] }
  0x38   : > { %416 = vrot.lane.b32.xlu1 %v411_v18, %s1264_s9  ;;  %414 = vrot.lane.b32.xlu0 %v410_v19, %s1264_s9  ;;  %437 = vst [vmem:[#allocation1 + $0x1] ss:$2 sm:$0xff] %v1332_v0 }
  0x3a   : > { %v412_v20 = vld.sshfl [vmem:[#allocation1 + $0x10] sm:$0xff pattern:$0x75316420]  ;;  %v413_v21 = vld.sshfl [vmem:[#allocation1 + $0x18] sm:$0xff pattern:$0x75316420] }
  0x3b   : > { %439 = vst [vmem:[#allocation1 + $0x11] ss:$2 sm:$0xff] %v374_v12 }
  0x3f   : > { %v441_v22 = vld.sshfl [vmem:[#allocation1 + $0x8] sm:$0xff pattern:$0x75316420]  ;;  %v440_v23 = vld.sshfl [vmem:[#allocation1] sm:$0xff pattern:$0x75316420] }
  0x40   : > { %418 = vrot.lane.b32.xlu1 %v412_v20, %s1264_s9  ;;  %446 = vrot.lane.b32.xlu0 %v441_v22, %s1265_s10  ;;  %466 = vst [vmem:[#allocation1] ss:$2 sm:$0xff] %v1332_v0 }
  0x41   : > { %444 = vrot.lane.b32.xlu2 %v440_v23, %s1265_s10 }
  0x42   : > { %v443_v24 = vld.sshfl [vmem:[#allocation1 + $0x18] sm:$0xff pattern:$0x75316420]  ;;  %v442_v25 = vld.sshfl [vmem:[#allocation1 + $0x10] sm:$0xff pattern:$0x75316420] }
  0x43   : > { %468 = vst [vmem:[#allocation1 + $0x10] ss:$2 sm:$0xff] %v374_v12 }
  0x47   : > { %v469_v26 = vld.sshfl [vmem:[#allocation1] sm:$0xff pattern:$0x75316420]  ;;  %v470_v27 = vld.sshfl [vmem:[#allocation1 + $0x8] sm:$0xff pattern:$0x75316420] }
  0x48   : > { %473 = vrot.lane.b32.xlu1 %v469_v26, %s1266_s11  ;;  %496 = vst [vmem:[#allocation1 + $0x1] ss:$2 sm:$0xff] %v1332_v0 }
  0x49   : > { %448 = vrot.lane.b32.xlu2 %v442_v25, %s1265_s10 }
  0x4a   : > { %v471_v28 = vld.sshfl [vmem:[#allocation1 + $0x10] sm:$0xff pattern:$0x75316420]  ;;  %v472_v29 = vld.sshfl [vmem:[#allocation1 + $0x18] sm:$0xff pattern:$0x75316420] }
  0x4b   : > { %498 = vst [vmem:[#allocation1 + $0x11] ss:$2 sm:$0xff] %v374_v12 }
  0x4f   : > { %v499_v30 = vld.sshfl [vmem:[#allocation1] sm:$0xff pattern:$0x75316420]  ;;  %v500_v31 = vld.sshfl [vmem:[#allocation1 + $0x8] sm:$0xff pattern:$0x75316420] }
  0x50   : > { %475 = vrot.lane.b32.xlu1 %v470_v27, %s1266_s11  ;;  %525 = vst [vmem:[#allocation1] ss:$2 sm:$0xff] %v1332_v0 }
  0x51   : > { %477 = vrot.lane.b32.xlu2 %v471_v28, %s1266_s11 }
  0x52   : > { %v501_v32 = vld.sshfl [vmem:[#allocation1 + $0x10] sm:$0xff pattern:$0x75316420]  ;;  %v502_v33 = vld.sshfl [vmem:[#allocation1 + $0x18] sm:$0xff pattern:$0x75316420] }
  0x53   : > { %507 = vrot.lane.b32.xlu0 %v501_v32, %s1267_s12  ;;  %527 = vst [vmem:[#allocation1 + $0x10] ss:$2 sm:$0xff] %v374_v12  ;;  %v572_v32 = vld [vmem:[%s1598_s3 + $0x18] sm:$0xff] }
  0x57   : > { %v528_v34 = vld.sshfl [vmem:[#allocation1] sm:$0xff pattern:$0x75316420]  ;;  %v529_v36 = vld.sshfl [vmem:[#allocation1 + $0x8] sm:$0xff pattern:$0x75316420] }
  0x58   : > { %389 = vrot.lane.b32.xlu1 %v383_v16, %s1263_s8 }
  0x59   : > { %503 = vrot.lane.b32.xlu2 %v499_v30, %s1267_s12 }
  0x5a   : > { %v530_v35 = vld.sshfl [vmem:[#allocation1 + $0x10] sm:$0xff pattern:$0x75316420]  ;;  %v531_v37 = vld.sshfl [vmem:[#allocation1 + $0x18] sm:$0xff pattern:$0x75316420] }
  0x5b   : > { %532 = vrot.lane.b32.xlu0 %v528_v34, %s1268_s13  ;;  %v550_v34 = vld [vmem:[%s1597_s2] sm:$0xff] }
  0x60   : > { %536 = vrot.lane.b32.xlu1 %v530_v35, %s1268_s13 }
  0x61   : > { %505 = vrot.lane.b32.xlu2 %v500_v31, %s1267_s12 }
  0x63   : > { %534 = vrot.lane.b32.xlu0 %v529_v36, %s1268_s13 }
  0x68   : > { %479 = vrot.lane.b32.xlu1 %v472_v29, %s1266_s11 }
  0x69   : > { %336 = vrot.lane.b32.xlu2 %v1341_v9, %s1261_s30 }
  0x6b   : > { %362 = vrot.lane.b32.xlu0 %v357_v13, %s1262_s7  ;;  %v569_v13 = vld [vmem:[%s1598_s3] sm:$0xff] }
  0x70   : > { %450 = vrot.lane.b32.xlu1 %v443_v24, %s1265_s10 }
  0x71   : > { %509 = vrot.lane.b32.xlu2 %v502_v33, %s1267_s12 }
  0x73   : > { %538 = vrot.lane.b32.xlu0 %v531_v37, %s1268_s13 }
  0x78   : > { %585 = vperm.xlu1 %1205, %v571_v7  }
  0x79   : > { %391 = vrot.lane.b32.xlu2 %v384_v17, %s1263_s8 }
  0x7a   : > { %v333_v38 = vpop.permute.xlu2 %332 }
  0x7b   : > { %420 = vrot.lane.b32.xlu0 %v413_v21, %s1264_s9 }
  0x80   : > { %575 = vperm.xlu1 %1205, %v569_v13  }
  0x82   : > { %v1378_v39 = vpop.permute.xlu2 %360 }
  0x83   : > { %590 = vperm.xlu0 %1204, %v572_v32  }
  0x92   : > { %v335_v40 = vpop.permute.xlu0 %334 }
  0x93   : > { %v339_v41 = vsel %vm338_vm0, %v333_v38, %v335_v40 }
  0x94   : > { %344 = vst [vmem:[#allocation2] sm:$0xf0] %v339_v41  ;;  %v551_v41 = vld [vmem:[%s1597_s2 + $0x8] sm:$0xff] }
  0x9a   : > { %v359_v42 = vpop.permute.xlu1 %358 }
  0x9b   : > { %v365_v43 = vsel %vm364_vm1, %v359_v42, %v1378_v39  ;;  %v445_v44 = vpop.permute.xlu2 %444  ;;  %v554_v36 = vld [vmem:[#allocation2] sm:$0xff] }
  0x9c   : > { %370 = vst [vmem:[#allocation2 + $0x18] sm:$0xf] %v365_v43 }
  0xa2   : > { %v388_v45 = vpop.permute.xlu1 %387  ;;  %v386_v46 = vpop.permute.xlu0 %385 }
  0xa3   : > { %v394_v47 = vsel %vm393_vm2, %v386_v46, %v388_v45  ;;  %v1384_v48 = vpop.permute.xlu2 %448 }
  0xa4   : > { %400 = vst [vmem:[#allocation2 + $0x18] sm:$0xf0] %v394_v47 }
  0xaa   : > { %v417_v49 = vpop.permute.xlu1 %416  ;;  %v415_v50 = vpop.permute.xlu0 %414 }
  0xab   : > { %v423_v51 = vsel %vm422_vm3, %v415_v50, %v417_v49  ;;  %v478_v52 = vpop.permute.xlu2 %477  ;;  %v557_v31 = vld [vmem:[#allocation2 + $0x18] sm:$0xff] }
  0xac   : > { %429 = vst [vmem:[#allocation2 + $0x30] sm:$0xf] %v423_v51 }
  0xb2   : > { %v1387_v53 = vpop.permute.xlu1 %418  ;;  %v447_v54 = vpop.permute.xlu0 %446 }
  0xb3   : > { %v424_v55 = vsel %vm422_vm3, %v417_v49, %v1387_v53  ;;  %v453_v56 = vsel %vm452_vm4, %v445_v44, %v447_v54  ;;  %v454_v57 = vsel %vm452_vm4, %v447_v54, %v1384_v48  ;;  %v504_v58 = vpop.permute.xlu2 %503  ;;  %v553_v49 = vld [vmem:[%s1597_s2 + $0x18] sm:$0xff] }
  0xb4   : > { %430 = vst [vmem:[#allocation2 + $0x38] sm:$0xf] %v424_v55 }
  0xb5   : > { %459 = vst [vmem:[#allocation2 + $0x30] sm:$0xf0] %v453_v56 }
  0xb6   : > { %460 = vst [vmem:[#allocation2 + $0x38] sm:$0xf0] %v454_v57 }
  0xba   : > { %v474_v59 = vpop.permute.xlu1 %473 }
  0xbb   : > { %v506_v60 = vpop.permute.xlu2 %505 }
  0xbc   : > { %v512_v61 = vsel %vm511_vm6, %v504_v58, %v506_v60  ;;  %v560_v27 = vld [vmem:[#allocation2 + $0x30] sm:$0xff] }
  0xbd   : > { %518 = vst [vmem:[#allocation2 + $0x48] sm:$0xf0] %v512_v61  ;;  %v561_v29 = vld [vmem:[#allocation2 + $0x38] sm:$0xff] }
  0xc2   : > { %v476_v62 = vpop.permute.xlu1 %475 }
  0xc3   : > { %v482_v63 = vsel %vm481_vm7, %v474_v59, %v476_v62  ;;  %v483_v0 = vsel %vm481_vm7, %v476_v62, %v478_v52  ;;  %v337_v1 = vpop.permute.xlu2 %336 }
  0xc4   : > { %488 = vst [vmem:[#allocation2 + $0x48] sm:$0xf] %v482_v63  ;;  %v340_v2 = vsel %vm338_vm0, %v335_v40, %v337_v1 }
  0xc5   : > { %v508_v3 = vpop.permute.xlu0 %507  ;;  %489 = vst [vmem:[#allocation2 + $0x50] sm:$0xf] %v483_v0 }
  0xc6   : > { %v513_v4 = vsel %vm511_vm6, %v506_v60, %v508_v3  ;;  %345 = vst [vmem:[#allocation2 + $0x8] sm:$0xf0] %v340_v2 }
  0xc7   : > { %519 = vst [vmem:[#allocation2 + $0x50] sm:$0xf0] %v513_v4 }
  0xc8   : > { %347 = vst.msk [vmem:[#allocation2 + $0x10] sm:$0xf0] %vm346_vm8, %v337_v1 }
  0xca   : > { %v390_v5 = vpop.permute.xlu1 %389 }
  0xcb   : > { %v395_v8 = vsel %vm393_vm2, %v388_v45, %v390_v5  ;;  %v510_v9 = vpop.permute.xlu2 %509  ;;  %v563_v25 = vld [vmem:[#allocation2 + $0x48] sm:$0xff] }
  0xcc   : > { %401 = vst [vmem:[#allocation2 + $0x20] sm:$0xf0] %v395_v8  ;;  %v514_v10 = vsel %vm511_vm6, %v508_v3, %v510_v9  ;;  %v552_v45 = vld [vmem:[%s1597_s2 + $0x10] sm:$0xff] }
  0xcd   : > { %520 = vst.msk [vmem:[#allocation2 + $0x58] sm:$0xf0] %vm346_vm8, %v514_v10  ;;  %v533_v11 = vpop.permute.xlu0 %532  ;;  %v555_v38 = vld [vmem:[#allocation2 + $0x8] sm:$0xff] }
  0xce   : > { %v564_v26 = vld [vmem:[#allocation2 + $0x50] sm:$0xff] }
  0xd2   : > { %v537_v12 = vpop.permute.xlu1 %536 }
  0xd3   : > { %v392_v14 = vpop.permute.xlu2 %391 }
  0xd4   : > { %v396_v15 = vsel %vm393_vm2, %v390_v5, %v392_v14 }
  0xd5   : > { %402 = vst.msk [vmem:[#allocation2 + $0x28] sm:$0xf0] %vm346_vm8, %v396_v15  ;;  %v535_v16 = vpop.permute.xlu0 %534 }
  0xd6   : > { %v541_v17 = vsel %vm540_vm9, %v533_v11, %v535_v16  ;;  %v542_v18 = vsel %vm540_vm9, %v535_v16, %v537_v12 }
  0xd7   : > { %547 = vst [vmem:[#allocation2 + $0x60] sm:$0xf] %v541_v17 }
  0xd8   : > { %548 = vst [vmem:[#allocation2 + $0x68] sm:$0xf] %v542_v18 }
  0xda   : > { %v480_v19 = vpop.permute.xlu1 %479 }
  0xdb   : > { %v484_v20 = vsel %vm481_vm7, %v478_v52, %v480_v19 }
  0xdc   : > { %490 = vst.msk [vmem:[#allocation2 + $0x58] sm:$0xf] %vm319_vm5, %v484_v20 }
  0xdd   : > { %v363_v21 = vpop.permute.xlu0 %362 }
  0xde   : > { %v366_v22 = vsel %vm364_vm1, %v1378_v39, %v363_v21  ;;  %372 = vst.msk [vmem:[#allocation2 + $0x28] sm:$0xf] %vm319_vm5, %v363_v21  ;;  %v566_v23 = vld [vmem:[#allocation2 + $0x60] sm:$0xf] }
  0xdf   : > { %371 = vst [vmem:[#allocation2 + $0x20] sm:$0xf] %v366_v22  ;;  %1142 = vmatpush.msk.msra.mxu0 %vm606_vm10, %v566_v23  ;;  %v567_v24 = vld [vmem:[#allocation2 + $0x68] sm:$0xf]  ;;  %v570_v39 = vld [vmem:[%s1598_s3 + $0x8] sm:$0xff] }
  0xe0   : > { %1147 = vmatpush.msk.msra.mxu1 %vm606_vm10, %v567_v24  ;;  %580 = vperm.xlu2 %1206, %v570_v39  }
  0xe1   : > { %628 = vmatpush.msra.mxu0 %v563_v25 }
  0xe2   : > { %657 = vmatpush.msra.mxu1 %v564_v26  ;;  %v451_v28 = vpop.permute.xlu1 %450  ;;  %v1485_v26 = vld [vmem:[%s1596_s1] sm:$0x7] }
  0xe3   : > { %629 = vmatpush.msra.mxu0 %v560_v27  ;;  %v455_v30 = vsel %vm452_vm4, %v1384_v48, %v451_v28  ;;  %v565_v44 = vld [vmem:[#allocation2 + $0x58] sm:$0xff]  ;;  %v556_v48 = vld [vmem:[#allocation2 + $0x10] sm:$0xff]  ;;  %v765_v32 = vperm.slane %v1485_v26, 0 }
  0xe4   : > { %658 = vmatpush.msra.mxu1 %v561_v29  ;;  %461 = vst.msk [vmem:[#allocation2 + $0x40] sm:$0xf0] %vm346_vm8, %v455_v30 }
  0xe5   : > { %630 = vmatpush.msra.mxu0 %v557_v31  ;;  %v539_v33 = vpop.permute.xlu0 %538  ;;  %v559_v47 = vld [vmem:[#allocation2 + $0x28] sm:$0xff] }
  0xe6   : > { %v543_v35 = vsel %vm540_vm9, %v537_v12, %v539_v33  ;;  %v558_v37 = vld [vmem:[#allocation2 + $0x20] sm:$0xff] }
  0xe7   : > { %549 = vst.msk [vmem:[#allocation2 + $0x70] sm:$0xf] %vm319_vm5, %v543_v35  ;;  %631 = vmatpush.msra.mxu0 %v554_v36  ;;  %659 = vmatpush.msra.mxu1 %v558_v37 }
  0xe8   : > { %1143 = vmatmul.msk.f32.vlgmr.msra.gmra.mxu0 %vm593_vm11, %v550_v34 }
  0xe9   : > { %660 = vmatpush.msra.mxu1 %v555_v38 }
  0xea   : > { %1148 = vmatmul.msk.f32.vlgmr.msra.gmra.mxu1 %vm593_vm11, %v550_v34  ;;  %v1461_v52 = vpop.permute.xlu1 %585 }
  0xed   : > { %v421_v40 = vpop.permute.xlu0 %420 }
  0xee   : > { %v425_v42 = vsel %vm422_vm3, %v1387_v53, %v421_v40  ;;  %v568_v43 = vld [vmem:[#allocation2 + $0x70] sm:$0xf] }
  0xef   : > { %431 = vst.msk [vmem:[#allocation2 + $0x40] sm:$0xf] %vm319_vm5, %v425_v42  ;;  %1152 = vmatpush.msk.msra.mxu2 %vm606_vm10, %v568_v43 }
  0xf0   : > { %1144 = vmatmul.msk.f32.gmra.mxu0 %vm593_vm11, %v551_v41 }
  0xf1   : > { %686 = vmatpush.msra.mxu2 %v565_v44 }
  0xf2   : > { %1149 = vmatmul.msk.f32.gmra.mxu1 %vm593_vm11, %v551_v41  ;;  %v1463_v56 = vpop.permute.xlu1 %575 }
  0xf5   : > { %v1470_v1 = vpop.permute.xlu0 %590 }
  0xf6   : > { %v562_v46 = vld [vmem:[#allocation2 + $0x40] sm:$0xff] }
  0xf7   : > { %687 = vmatpush.msra.mxu2 %v562_v46 }
  0xf8   : > { %1145 = vmatmul.msk.f32.gmra.mxu0 %vm593_vm11, %v552_v45 }
  0xf9   : > { %688 = vmatpush.msra.mxu2 %v559_v47 }
  0xfa   : > { %1150 = vmatmul.msk.f32.gmra.mxu1 %vm593_vm11, %v552_v45 }
  0xfb   : > { %689 = vmatpush.msra.mxu2 %v556_v48 }
  0xfc   : > { %1153 = vmatmul.msk.f32.vlgmr.msra.gmra.mxu2 %vm593_vm11, %v550_v34 }
 0x100   : > { %1146 = vmatmul.msk.f32.gmra.mxu0 %vm593_vm11, %v553_v49 }
 0x102   : > { %1151 = vmatmul.msk.f32.gmra.mxu1 %vm593_vm11, %v553_v49 }
 0x104   : > { %1154 = vmatmul.msk.f32.gmra.mxu2 %vm593_vm11, %v551_v41 }
 0x10c   : > { %1155 = vmatmul.msk.f32.gmra.mxu2 %vm593_vm11, %v552_v45 }
 0x114   : > { %1156 = vmatmul.msk.f32.gmra.mxu2 %vm593_vm11, %v553_v49 }
 0x13a   : > { %v581_v55 = vpop.permute.xlu2 %580 }
 0x165   : > { %v633_v50 = vpop.f32.mrf.mxu0 }
 0x166   : > { %v634_v61 = vadd.f32 %v633_v50, %v1463_v56 }
 0x167   : > { %v662_v51 = vpop.f32.mrf.mxu1 }
 0x168   : > { %v703_v2 = vmul.f32 0.5, %v634_v61  ;;  %v1477_v9 = vadd.f32 %v662_v51, %v1463_v56 }
 0x16a   : > { %v704_v16 = vmul.f32 0.5, %v1477_v9 }
 0x16d   : > { %v636_v53 = vpop.f32.mrf.mxu0 }
 0x16e   : > { %v637_v58 = vadd.f32 %v636_v53, %v581_v55 }
 0x16f   : > { %v665_v54 = vpop.f32.mrf.mxu1 }
 0x170   : > { %v706_v63 = vmul.f32 0.5, %v637_v58  ;;  %v1472_v4 = vadd.f32 %v665_v54, %v581_v55 }
 0x172   : > { %v707_v13 = vmul.f32 0.5, %v1472_v4 }
 0x175   : > { %v639_v57 = vpop.f32.mrf.mxu0 }
 0x176   : > { %v640_v59 = vadd.f32 %v639_v57, %v1461_v52 }
 0x177   : > { %v668_v60 = vpop.f32.mrf.mxu1 }
 0x178   : > { %v709_v62 = vmul.f32 0.5, %v640_v59  ;;  %v1468_v0 = vadd.f32 %v668_v60, %v1461_v52  ;;  %v784_v60 = vld [vmem:[%s1599_s4 + $0x8] sm:$0x1] }
 0x17a   : > { %1207 = vtanh.f32 %v709_v62  ;;  %v710_v6 = vmul.f32 0.5, %v1468_v0 }
 0x17b   : > { %1209 = vtanh.f32 %v706_v63 }
 0x17c   : > { %1211 = vtanh.f32 %v703_v2 }
 0x17d   : > { %v642_v3 = vpop.f32.mrf.mxu0 }
 0x17e   : > { %v643_v5 = vadd.f32 %v642_v3, %v1470_v1 }
 0x17f   : > { %v671_v7 = vpop.f32.mrf.mxu1  ;;  %v691_v8 = vpop.f32.mrf.mxu2 }
 0x180   : > { %v712_v10 = vmul.f32 0.5, %v643_v5  ;;  %v672_v11 = vadd.f32 %v671_v7, %v1470_v1  ;;  %v1208_v12 = vpop.eup %1207  ;;  %v692_v49 = vadd.f32 %v691_v8, %v1463_v56  ;;  %v783_v56 = vld [vmem:[%s1599_s4] sm:$0xff] }
 0x181   : > { %v1210_v15 = vpop.eup %1209  ;;  %v733_v17 = vmul.f32 0.5, %v1208_v12 }
 0x182   : > { %1213 = vtanh.f32 %v712_v10  ;;  %v713_v14 = vmul.f32 0.5, %v672_v11  ;;  %v1212_v18 = vpop.eup %1211  ;;  %v730_v19 = vmul.f32 0.5, %v1210_v15 }
 0x183   : > { %1215 = vtanh.f32 %v710_v6  ;;  %v727_v23 = vmul.f32 0.5, %v1212_v18  ;;  %v745_v24 = vadd.f32 0.5, %v733_v17 }
 0x184   : > { %1217 = vtanh.f32 %v713_v14  ;;  %v742_v28 = vadd.f32 0.5, %v730_v19 }
 0x185   : > { %1219 = vtanh.f32 %v707_v13  ;;  %v739_v33 = vadd.f32 0.5, %v727_v23  ;;  %v757_v34 = vmul.f32 %v745_v24, %v640_v59 }
 0x186   : > { %1221 = vtanh.f32 %v704_v16  ;;  %v754_v38 = vmul.f32 %v742_v28, %v637_v58 }
 0x187   : > { %v694_v20 = vpop.f32.mrf.mxu2  ;;  %v751_v45 = vmul.f32 %v739_v33, %v634_v61  ;;  %v777_v48 = vmul.f32 %v765_v32, %v757_v34  ;;  %v705_v61 = vmul.f32 0.5, %v692_v49 }
 0x188   : > { %v1214_v21 = vpop.eup %1213  ;;  %v1488_v43 = vadd.f32 %v694_v20, %v581_v55  ;;  %v774_v54 = vmul.f32 %v765_v32, %v754_v38  ;;  %v766_v55 = vperm.slane %v1485_v26, 1 }
 0x189   : > { %v1216_v22 = vpop.eup %1215  ;;  %v736_v25 = vmul.f32 0.5, %v1214_v21  ;;  %v771_v59 = vmul.f32 %v765_v32, %v751_v45  ;;  %v767_v21 = vperm.slane %v1485_v26, 2 }
 0x18a   : > { %v1218_v27 = vpop.eup %1217  ;;  %v734_v35 = vmul.f32 0.5, %v1216_v22  ;;  %v708_v57 = vmul.f32 0.5, %v1488_v43 }
 0x18b   : > { %v748_v29 = vadd.f32 0.5, %v736_v25  ;;  %v737_v30 = vmul.f32 0.5, %v1218_v27  ;;  %v1220_v31 = vpop.eup %1219 }
 0x18c   : > { %v1222_v37 = vpop.eup %1221  ;;  %v731_v39 = vmul.f32 0.5, %v1220_v31  ;;  %v746_v47 = vadd.f32 0.5, %v734_v35 }
 0x18d   : > { %v760_v36 = vmul.f32 %v748_v29, %v643_v5  ;;  %v749_v40 = vadd.f32 0.5, %v737_v30  ;;  %v728_v46 = vmul.f32 0.5, %v1222_v37 }
 0x18e   : > { %v743_v51 = vadd.f32 0.5, %v731_v39 }
 0x18f   : > { %v697_v41 = vpop.f32.mrf.mxu2  ;;  %v780_v42 = vmul.f32 %v765_v32, %v760_v36  ;;  %v761_v53 = vmul.f32 %v749_v40, %v672_v11  ;;  %v740_v58 = vadd.f32 0.5, %v728_v46 }
 0x190   : > { %v698_v44 = vadd.f32 %v697_v41, %v1461_v52  ;;  %v758_v52 = vmul.f32 %v746_v47, %v1468_v0  ;;  %v755_v62 = vmul.f32 %v743_v51, %v1472_v4 }
 0x191   : > { %804 = vmatpush.msrb.mxu0 %v780_v42  ;;  %1166 = vmatpush.msra.mxu3 %v780_v42  ;;  %v781_v0 = vmul.f32 %v766_v55, %v761_v53  ;;  %v752_v3 = vmul.f32 %v740_v58, %v1477_v9 }
 0x192   : > { %v711_v50 = vmul.f32 0.5, %v698_v44  ;;  %v778_v5 = vmul.f32 %v766_v55, %v758_v52  ;;  %v775_v7 = vmul.f32 %v766_v55, %v755_v62 }
 0x193   : > { %805 = vmatpush.msrb.mxu0 %v777_v48  ;;  %1167 = vmatpush.msra.mxu3 %v777_v48  ;;  %v772_v8 = vmul.f32 %v766_v55, %v752_v3 }
 0x194   : > { %1223 = vtanh.f32 %v711_v50 }
 0x195   : > { %806 = vmatpush.msrb.mxu0 %v774_v54  ;;  %1168 = vmatpush.msra.mxu3 %v774_v54  ;;  %1225 = vtanh.f32 %v708_v57 }
 0x196   : > { %1227 = vtanh.f32 %v705_v61 }
 0x197   : > { %v700_v63 = vpop.f32.mrf.mxu2  ;;  %807 = vmatpush.msrb.mxu0 %v771_v59  ;;  %1169 = vmatpush.msra.mxu3 %v771_v59 }
 0x198   : > { %v701_v2 = vadd.f32 %v700_v63, %v1470_v1  ;;  %1157 = vmatmul.msk.f32.vlgmr.msrb.gmra.mxu0 %vm785_vm12, %v783_v56  ;;  %1158 = vmatmul.msk.f32.vlgmr.msra.gmra.mxu3 %vm785_vm12, %v784_v60 }
 0x199   : > { %827 = vmatpush.msrb.mxu3 %v781_v0 }
 0x19a   : > { %v714_v6 = vmul.f32 0.5, %v701_v2  ;;  %v1224_v4 = vpop.eup %1223 }
 0x19b   : > { %828 = vmatpush.msrb.mxu3 %v778_v5  ;;  %v1226_v10 = vpop.eup %1225  ;;  %v735_v11 = vmul.f32 0.5, %v1224_v4 }
 0x19c   : > { %1229 = vtanh.f32 %v714_v6  ;;  %v1228_v1 = vpop.eup %1227  ;;  %v732_v12 = vmul.f32 0.5, %v1226_v10 }
 0x19d   : > { %829 = vmatpush.msrb.mxu3 %v775_v7  ;;  %v729_v14 = vmul.f32 0.5, %v1228_v1  ;;  %v747_v9 = vadd.f32 0.5, %v735_v11 }
 0x19e   : > { %v744_v16 = vadd.f32 0.5, %v732_v12 }
 0x19f   : > { %830 = vmatpush.msrb.mxu3 %v772_v8  ;;  %v741_v18 = vadd.f32 0.5, %v729_v14  ;;  %v759_v19 = vmul.f32 %v747_v9, %v698_v44 }
 0x1a0   : > { %1159 = vmatmul.msk.f32.vlgmr.msrb.gmra.mxu3 %vm785_vm12, %v783_v56  ;;  %v756_v22 = vmul.f32 %v744_v16, %v1488_v43 }
 0x1a1   : > { %v753_v24 = vmul.f32 %v741_v18, %v692_v49  ;;  %v779_v25 = vmul.f32 %v767_v21, %v759_v19 }
 0x1a2   : > { %v1230_v13 = vpop.eup %1229  ;;  %v776_v27 = vmul.f32 %v767_v21, %v756_v22 }
 0x1a3   : > { %v738_v15 = vmul.f32 0.5, %v1230_v13  ;;  %v773_v28 = vmul.f32 %v767_v21, %v753_v24 }
 0x1a5   : > { %v750_v17 = vadd.f32 0.5, %v738_v15 }
 0x1a7   : > { %v762_v20 = vmul.f32 %v750_v17, %v701_v2 }
 0x1a8   : > { %1160 = vmatmul.msk.f32.gmra.mxu3 %vm785_vm12, %v784_v60 }
 0x1a9   : > { %v782_v23 = vmul.f32 %v767_v21, %v762_v20 }
 0x1ab   : > { %850 = vmatpush.msra.mxu3 %v782_v23 }
 0x1ad   : > { %851 = vmatpush.msra.mxu3 %v779_v25 }
 0x1af   : > { %852 = vmatpush.msra.mxu3 %v776_v27 }
 0x1b1   : > { %853 = vmatpush.msra.mxu3 %v773_v28 }
 0x1b2   : > { %1161 = vmatmul.msk.f32.vlgmr.msra.gmra.mxu3 %vm785_vm12, %v783_v56 }
 0x1ba   : > { %1162 = vmatmul.msk.f32.gmra.mxu3 %vm785_vm12, %v784_v60 }
 0x215   : > { %v1512_v29 = vpop.f32.mrf.mxu0 }
 0x216   : > { %v869_v26 = vrot.slane %v1512_v29, 1  ;;  %v886_v31 = vrot.slane %v1512_v29, 2  ;;  %v903_v34 = vrot.slane %v1512_v29, 3  ;;  %v920_v37 = vrot.slane %v1512_v29, 4 }
 0x217   : > { %v937_v39 = vrot.slane %v1512_v29, 5  ;;  %v954_v44 = vrot.slane %v1512_v29, 6  ;;  %v971_v47 = vrot.slane %v1512_v29, 7 }
 0x218   : > { %872 = vrot.lane.b32.xlu1 %v869_v26, %s1261_s30 }
 0x21b   : > { %v812_v30 = vpop.f32.mrf.mxu3 }
 0x220   : > { %889 = vrot.lane.b32.xlu1 %v886_v31, %s1262_s7 }
 0x223   : > { %v1518_v32 = vpop.f32.mrf.mxu3 }
 0x224   : > { %v870_v33 = vrot.slane %v1518_v32, 1  ;;  %v887_v36 = vrot.slane %v1518_v32, 2  ;;  %v904_v38 = vrot.slane %v1518_v32, 3  ;;  %v921_v42 = vrot.slane %v1518_v32, 4 }
 0x225   : > { %v938_v45 = vrot.slane %v1518_v32, 5  ;;  %v955_v48 = vrot.slane %v1518_v32, 6  ;;  %v972_v50 = vrot.slane %v1518_v32, 7 }
 0x226   : > { %874 = vrot.lane.b32.xlu2 %v870_v33, %s1261_s30 }
 0x228   : > { %906 = vrot.lane.b32.xlu1 %v903_v34, %s1263_s8 }
 0x22b   : > { %v835_v35 = vpop.f32.mrf.mxu3 }
 0x22e   : > { %891 = vrot.lane.b32.xlu2 %v887_v36, %s1262_s7 }
 0x230   : > { %923 = vrot.lane.b32.xlu1 %v920_v37, %s1264_s9 }
 0x235   : > { %v1530_v40 = vpop.f32.mrf.mxu3 }
 0x236   : > { %908 = vrot.lane.b32.xlu2 %v904_v38, %s1263_s8  ;;  %v871_v41 = vrot.slane %v1530_v40, 1  ;;  %v888_v43 = vrot.slane %v1530_v40, 2  ;;  %v905_v46 = vrot.slane %v1530_v40, 3  ;;  %v922_v49 = vrot.slane %v1530_v40, 4 }
 0x237   : > { %v939_v51 = vrot.slane %v1530_v40, 5  ;;  %v956_v53 = vrot.slane %v1530_v40, 6  ;;  %v973_v54 = vrot.slane %v1530_v40, 7 }
 0x238   : > { %876 = vrot.lane.b32.xlu0 %v871_v41, %s1261_s30  ;;  %940 = vrot.lane.b32.xlu1 %v937_v39, %s1265_s10  ;;  %s861_s30 = sld [smem:[#allocation3]] }
 0x23d   : > { %v858_v57 = vpop.f32.mrf.mxu3 }
 0x23e   : > { %925 = vrot.lane.b32.xlu2 %v921_v42, %s1264_s9  ;;  %v862_v10 = vstv %s861_s30 }
 0x23f   : > { %v863_v1 = vadd.f32 %v862_v10, %v1512_v29  ;;  %v865_v19 = vadd.f32 %v862_v10, %v1530_v40  ;;  %v864_v22 = vadd.f32 %v862_v10, %v1518_v32 }
 0x240   : > { %893 = vrot.lane.b32.xlu0 %v888_v43, %s1262_s7  ;;  %957 = vrot.lane.b32.xlu1 %v954_v44, %s1266_s11  ;;  %s1170_s7 = smul.u32 3, %s1607_s23 }
 0x246   : > { %942 = vrot.lane.b32.xlu2 %v938_v45, %s1265_s10 }
 0x248   : > { %910 = vrot.lane.b32.xlu0 %v905_v46, %s1263_s8  ;;  %974 = vrot.lane.b32.xlu1 %v971_v47, %s1267_s12 }
 0x24e   : > { %959 = vrot.lane.b32.xlu2 %v955_v48, %s1266_s11 }
 0x250   : > { %927 = vrot.lane.b32.xlu0 %v922_v49, %s1264_s9  ;;  %991 = vrot.lane.b32.xlu1 %v812_v30, %s1268_s13 }
 0x256   : > { %976 = vrot.lane.b32.xlu2 %v972_v50, %s1267_s12 }
 0x258   : > { %944 = vrot.lane.b32.xlu0 %v939_v51, %s1265_s10  ;;  %s303_s10 = scalar_lea.vmem %s1601_s6, %s1170_s7 }
 0x25e   : > { %993 = vrot.lane.b32.xlu2 %v835_v35, %s1268_s13 }
 0x260   : > { %961 = vrot.lane.b32.xlu0 %v956_v53, %s1266_s11 }
 0x268   : > { %978 = vrot.lane.b32.xlu0 %v973_v54, %s1267_s12 }
 0x270   : > { %995 = vrot.lane.b32.xlu0 %v858_v57, %s1268_s13 }
 0x280   : > { %v875_v58 = vpop.permute.xlu2 %874 }
 0x288   : > { %v892_v59 = vpop.permute.xlu2 %891 }
 0x28a   : > { %v873_v55 = vpop.permute.xlu1 %872 }
 0x28b   : > { %v878_v11 = vsel %vm338_vm0, %v873_v55, %v875_v58 }
 0x28c   : > { %v883_v14 = vadd.f32 %v878_v11, %v863_v1 }
 0x290   : > { %v909_v60 = vpop.permute.xlu2 %908 }
 0x292   : > { %v890_v52 = vpop.permute.xlu1 %889 }
 0x293   : > { %v895_v13 = vsel %vm364_vm1, %v890_v52, %v892_v59 }
 0x294   : > { %v900_v16 = vadd.f32 %v895_v13, %v883_v14 }
 0x298   : > { %v926_v63 = vpop.permute.xlu2 %925 }
 0x29a   : > { %v907_v56 = vpop.permute.xlu1 %906 }
 0x29b   : > { %v912_v15 = vsel %vm393_vm2, %v907_v56, %v909_v60 }
 0x29c   : > { %v917_v21 = vadd.f32 %v912_v15, %v900_v16 }
 0x2a0   : > { %v943_v5 = vpop.permute.xlu2 %942 }
 0x2a2   : > { %v924_v62 = vpop.permute.xlu1 %923 }
 0x2a3   : > { %v929_v18 = vsel %vm422_vm3, %v924_v62, %v926_v63 }
 0x2a4   : > { %v934_v27 = vadd.f32 %v929_v18, %v917_v21 }
 0x2a8   : > { %v960_v4 = vpop.permute.xlu2 %959 }
 0x2aa   : > { %v877_v61 = vpop.permute.xlu0 %876  ;;  %v941_v2 = vpop.permute.xlu1 %940 }
 0x2ab   : > { %v879_v20 = vsel %vm338_vm0, %v875_v58, %v877_v61  ;;  %v885_v23 = vadd.f32 %v877_v61, %v865_v19  ;;  %v946_v24 = vsel %vm452_vm4, %v941_v2, %v943_v5 }
 0x2ac   : > { %v884_v28 = vadd.f32 %v879_v20, %v864_v22  ;;  %v951_v31 = vadd.f32 %v946_v24, %v934_v27 }
 0x2b0   : > { %v977_v9 = vpop.permute.xlu2 %976 }
 0x2b2   : > { %v894_v0 = vpop.permute.xlu0 %893  ;;  %v958_v7 = vpop.permute.xlu1 %957 }
 0x2b3   : > { %v896_v25 = vsel %vm364_vm1, %v892_v59, %v894_v0  ;;  %v902_v29 = vadd.f32 %v894_v0, %v885_v23  ;;  %v963_v26 = vsel %vm481_vm7, %v958_v7, %v960_v4 }
 0x2b4   : > { %v901_v33 = vadd.f32 %v896_v25, %v884_v28  ;;  %v968_v37 = vadd.f32 %v963_v26, %v951_v31 }
 0x2b8   : > { %v994_v38 = vpop.permute.xlu2 %993 }
 0x2ba   : > { %v911_v3 = vpop.permute.xlu0 %910  ;;  %v975_v12 = vpop.permute.xlu1 %974 }
 0x2bb   : > { %v913_v30 = vsel %vm393_vm2, %v909_v60, %v911_v3  ;;  %v919_v35 = vadd.f32 %v911_v3, %v902_v29  ;;  %v980_v36 = vsel %vm511_vm6, %v975_v12, %v977_v9 }
 0x2bc   : > { %v918_v39 = vadd.f32 %v913_v30, %v901_v33  ;;  %v985_v44 = vadd.f32 %v980_v36, %v968_v37 }
 0x2c2   : > { %v928_v6 = vpop.permute.xlu0 %927  ;;  %v992_v34 = vpop.permute.xlu1 %991 }
 0x2c3   : > { %v930_v32 = vsel %vm422_vm3, %v926_v63, %v928_v6  ;;  %v936_v41 = vadd.f32 %v928_v6, %v919_v35  ;;  %v997_v42 = vsel %vm540_vm9, %v992_v34, %v994_v38  ;;  %v1027_v6 = vlaneseq }
 0x2c4   : > { %v935_v45 = vadd.f32 %v930_v32, %v918_v39  ;;  %v1002_v48 = vadd.f32 %v997_v42, %v985_v44 }
 0x2c5   : > { %vm1029_vm15 = vcmp.lt.s32.totalorder %v1027_v6, 320 }
 0x2c6   : > { %v1005_v57 = vmul.f32 0.5, %v1002_v48 }
 0x2c8   : > { %1231 = vtanh.f32 %v1005_v57 }
 0x2ca   : > { %v945_v8 = vpop.permute.xlu0 %944 }
 0x2cb   : > { %v947_v43 = vsel %vm452_vm4, %v943_v5, %v945_v8  ;;  %v953_v46 = vadd.f32 %v945_v8, %v936_v41 }
 0x2cc   : > { %v952_v49 = vadd.f32 %v947_v43, %v935_v45 }
 0x2ce   : > { %v1232_v62 = vpop.eup %1231 }
 0x2cf   : > { %v1011_v3 = vmul.f32 0.5, %v1232_v62 }
 0x2d1   : > { %v1014_v8 = vadd.f32 0.5, %v1011_v3 }
 0x2d2   : > { %v962_v17 = vpop.permute.xlu0 %961 }
 0x2d3   : > { %v964_v47 = vsel %vm481_vm7, %v960_v4, %v962_v17  ;;  %v970_v50 = vadd.f32 %v962_v17, %v953_v46 }
 0x2d4   : > { %v969_v53 = vadd.f32 %v964_v47, %v952_v49 }
 0x2da   : > { %v979_v40 = vpop.permute.xlu0 %978 }
 0x2db   : > { %v981_v51 = vsel %vm511_vm6, %v977_v9, %v979_v40  ;;  %v987_v54 = vadd.f32 %v979_v40, %v970_v50 }
 0x2dc   : > { %v986_v55 = vadd.f32 %v981_v51, %v969_v53 }
 0x2e2   : > { %v996_v58 = vpop.permute.xlu0 %995 }
 0x2e3   : > { %v998_v52 = vsel %vm540_vm9, %v994_v38, %v996_v58  ;;  %v1004_v59 = vadd.f32 %v996_v58, %v987_v54 }
 0x2e4   : > { %v1003_v56 = vadd.f32 %v998_v52, %v986_v55 }
 0x2e5   : > { %v1007_v60 = vmul.f32 0.5, %v1004_v59 }
 0x2e6   : > { %v1006_v61 = vmul.f32 0.5, %v1003_v56 }
 0x2e7   : > { %1233 = vtanh.f32 %v1007_v60 }
 0x2e8   : > { %1235 = vtanh.f32 %v1006_v61 }
 0x2ed   : > { %v1234_v63 = vpop.eup %1233 }
 0x2ee   : > { %v1236_v0 = vpop.eup %1235  ;;  %v1013_v2 = vmul.f32 0.5, %v1234_v63 }
 0x2ef   : > { %v1012_v5 = vmul.f32 0.5, %v1236_v0 }
 0x2f0   : > { %v1016_v7 = vadd.f32 0.5, %v1013_v2 }
 0x2f1   : > { %v1015_v4 = vadd.f32 0.5, %v1012_v5 }
 0x2f2   : > { %v1021_v11 = vrot.slane %v1016_v7, 6 }
 0x2f3   : > { %v1020_v10 = vrot.slane %v1015_v4, 7 }
 0x2f5   : > { %v1023_v1 = vsel %vm1022_vm13, %v1014_v8, %v1020_v10 }
 0x2f6   : > { %v1025_v12 = vsel %vm1024_vm14, %v1023_v1, %v1021_v11 }
 0x2f7   : > { %1031 = vst.msk [vmem:[%s303_s10] sm:$0x7] %vm1029_vm15, %v1025_v12 }
 0x2f8 PF: > { %s17_s25 = sadd.s32 1, %s1259_s25   ;;  %s1602_s23 = smov %s1255_s24 }
 0x2f9   : > { %p14_p5 = scmp.ge.s32.totalorder %s17_s25, 4   ;;  %s1603_s24 = smov %s1605_s5 }
 0x2fb   :  { %16 = sbr.rel (!%p14_p5) target bundleno = 2 (0x2), region = 90 }

</bundles_post_ra>
